<compile_context>
chip_gen: v6e
topology: v6e:2x2x1
jax: 0.10.0
libtpu: 0.0.40
codegen_flags: <defaults>
</compile_context>

<pallas_src>
import jax
import jax.numpy as jnp
from jax.experimental import pallas as pl
from jax.experimental.pallas import tpu as pltpu


def _round_up(a: int, b: int) -> int:
    return ((a + b - 1) // b) * b


def _make_score_kernel(precision, cast_dtype):
    def kernel(x_ref, c_ref, pt_ref, o_ref):
        x = x_ref[...]
        if cast_dtype is not None and x.dtype != cast_dtype:
            x = x.astype(cast_dtype)          # v5e path: bf16 operands, f32 accum
        acc = jnp.dot(
            x, pt_ref[...],
            precision=precision,
            preferred_element_type=jnp.float32,
        )
        # c is (1, W); broadcast subtract (VPU has huge slack in this mem-bound kernel).
        o_ref[...] = (c_ref[...] - acc).astype(o_ref.dtype)
    return kernel


def gaussian_score(x, mean, prec_mat, *, tile_rows=4096, low_precision_matmul=False):
    """Pallas TPU implementation of einsum('ij, ...j -> ...i', prec, mean - x)."""
    orig_shape = x.shape
    orig_dtype = x.dtype
    L = orig_shape[-1]

    prec32 = jnp.asarray(prec_mat, jnp.float32)
    prec_t = prec32.T                                  # (L, L)
    c32 = prec32 @ jnp.asarray(mean, jnp.float32)      # (L,)  folded mean term

    x2 = x.reshape(-1, L)                              # (B, L) — free reshape
    B = x2.shape[0]

    # ---- lane packing / lane-dense width -------------------------------------
    if L <= 128 and 128 % L == 0:
        pack, W, col_pad = 128 // L, 128, 0
    else:
        pack = 1
        W = _round_up(L, 128)                          # keep last dim lane-dense
        col_pad = W - L

    # ---- MXU operand dtype / precision ---------------------------------------
    if low_precision_matmul:
        mxu_dtype = jnp.bfloat16
    elif jnp.issubdtype(orig_dtype, jnp.floating) and jnp.dtype(orig_dtype).itemsize < 4:
        mxu_dtype = orig_dtype                         # bf16/f16 inputs stay narrow
    else:
        mxu_dtype = jnp.float32
    precision = (jax.lax.Precision.HIGHEST
                 if jnp.dtype(mxu_dtype) == jnp.dtype(jnp.float32) else None)

    # ---- resident constants ----------------------------------------------------
    if pack > 1:
        prec_t_big = jnp.kron(jnp.eye(pack, dtype=jnp.float32), prec_t)   # block-diag
        c_big = jnp.tile(c32, pack).reshape(1, W)
    elif col_pad:
        prec_t_big = jnp.zeros((W, W), jnp.float32).at[:L, :L].set(prec_t)
        c_big = jnp.zeros((1, W), jnp.float32).at[0, :L].set(c32)
    else:
        prec_t_big, c_big = prec_t, c32.reshape(1, W)
    prec_t_big = prec_t_big.astype(mxu_dtype)

    # ---- ragged tail (< pack rows) handled with plain jnp ----------------------
    def _jnp_tail(xt):
        acc = jnp.dot(xt.astype(jnp.float32), prec_t,
                      precision=jax.lax.Precision.HIGHEST)
        return (c32 - acc).astype(orig_dtype)

    rem = B % pack
    B_full = B - rem
    if B_full == 0:
        return _jnp_tail(x2).reshape(orig_shape)

    x_bulk = x2 if rem == 0 else x2[:B_full]
    if col_pad:
        # Guarded path (128 % L != 0): one column-pad pass buys lane-dense stores.
        x_bulk = jnp.pad(x_bulk, ((0, 0), (0, col_pad)))
    xp = x_bulk.reshape(B_full // pack, W)             # packed lane-dense view
    rows = xp.shape[0]

    # ---- batch tile selection ---------------------------------------------------
    target_steps = 4                                   # >= 2 steps/TC on dual-core v7x
    TB = min(tile_rows, _round_up(rows, 16))           # 16-sublane aligned (bf16-safe)
    TB = min(TB, max(512, _round_up(pl.cdiv(rows, target_steps), 16)))
    TB = max(16, _round_up(TB, 16))
    if TB >= rows:
        TB = rows                                      # single full block, no edge mask
    grid = (pl.cdiv(rows, TB),)

    # ---- right-sized scoped VMEM (2x double-buffered blocks + constants, 2x margin)
    blk_bytes = TB * W * jnp.dtype(orig_dtype).itemsize
    const_bytes = W * W * jnp.dtype(mxu_dtype).itemsize + W * 4
    need = 2 * (blk_bytes + blk_bytes) + 2 * const_bytes
    vmem_limit = int(min(max(2 * need, 24 * 1024 * 1024), 48 * 1024 * 1024))

    kernel = _make_score_kernel(precision, mxu_dtype if low_precision_matmul else None)

    out = pl.pallas_call(
        kernel,
        out_shape=jax.ShapeDtypeStruct((rows, W), orig_dtype),
        grid_spec=pltpu.PrefetchScalarGridSpec(
            num_scalar_prefetch=0,
            grid=grid,
            in_specs=[
                pl.BlockSpec((TB, W), lambda i: (i, 0)),   # x tile: streamed/pipelined
                pl.BlockSpec((1, W), lambda i: (0, 0)),    # folded mean c: resident
                pl.BlockSpec((W, W), lambda i: (0, 0)),    # block-diag prec.T: resident
            ],
            out_specs=pl.BlockSpec((TB, W), lambda i: (i, 0)),
        ),
        compiler_params=pltpu.CompilerParams(
            dimension_semantics=("parallel",),             # shard batch tiles across TCs
            vmem_limit_bytes=vmem_limit,
        ),
    )(xp, c_big, prec_t_big)

    if pack > 1:
        out_bulk = out.reshape(B_full, L)                  # free reshape back
    elif col_pad:
        out_bulk = out[:, :L]
    else:
        out_bulk = out

    if rem:
        out_bulk = jnp.concatenate([out_bulk, _jnp_tail(x2[B_full:])], axis=0)
    return out_bulk.reshape(orig_shape)


if __name__ == "__main__":
    key = jax.random.PRNGKey(0)
    k_a, k_mean, k_x1, k_x2 = jax.random.split(key, 4)

    L = 32  # Gaussian dimension

    # Deterministic symmetric positive-definite covariance and its inverse.
    A = jax.random.normal(k_a, (L, L), dtype=jnp.float32)
    covar_mat = A @ A.T + L * jnp.eye(L, dtype=jnp.float32)
    prec_mat = jnp.linalg.inv(covar_mat)
    mean = jax.random.normal(k_mean, (L,), dtype=jnp.float32)

    def reference(x):
        return jnp.einsum("ij,...j->...i", prec_mat, mean - x,
                          precision=jax.lax.Precision.HIGHEST)

    # Case 1: pack-aligned batch (no pad / slice / concat anywhere).
    x1 = jax.random.normal(k_x1, (2, 4, L), dtype=jnp.float32)
    out1 = jax.block_until_ready(gaussian_score(x1, mean, prec_mat))
    assert out1.shape == x1.shape and out1.dtype == x1.dtype
    assert jnp.allclose(out1, reference(x1), atol=1e-5, rtol=1e-5), "mismatch (case 1)"

    # Case 2: ragged batch -> kernel on the packed bulk, tiny tail via plain jnp.
    x2 = jax.random.normal(k_x2, (3, 5, L), dtype=jnp.float32)
    out2 = jax.block_until_ready(gaussian_score(x2, mean, prec_mat))
    assert out2.shape == x2.shape
    assert jnp.allclose(out2, reference(x2), atol=1e-5, rtol=1e-5), "mismatch (case 2)"

    # Case 3: v5e-style low-precision MXU operands (bf16 operands, f32 accumulate).
    out3 = jax.block_until_ready(
        gaussian_score(x1, mean, prec_mat, low_precision_matmul=True))
    assert jnp.allclose(out3, reference(x1), atol=5e-3, rtol=1e-2), "mismatch (case 3)"

    print("KERNEL_OK")
</pallas_src>

<mosaic_0001>
module attributes {stable_mosaic.version = 11 : i64} {
  func.func @kernel(%arg0: i32, %arg1: memref<2x128xf32, #tpu.memory_space<vmem>>, %arg2: memref<1x128xf32, #tpu.memory_space<vmem>>, %arg3: memref<128x128xf32, #tpu.memory_space<vmem>>, %arg4: memref<2x128xf32, #tpu.memory_space<vmem>>) attributes {dimension_semantics = [#tpu.dimension_semantics<parallel>], iteration_bounds = array<i64: 1>, scalar_prefetch = 0 : i64, scratch_operands = 0 : i64, tpu.core_type = #tpu.core_type<tc>, window_params = [{transform_indices = @transform_0, window_bounds = array<i64: 2, 128>}, {pipeline_mode = #tpu.pipeline_mode<synchronous>, transform_indices = @transform_1, window_bounds = array<i64: 1, 128>}, {pipeline_mode = #tpu.pipeline_mode<synchronous>, transform_indices = @transform_2, window_bounds = array<i64: 128, 128>}, {transform_indices = @transform_3, window_bounds = array<i64: 2, 128>}]} {
    %c0 = arith.constant 0 : index
    %c0_0 = arith.constant 0 : index
    %0 = vector.load %arg1[%c0, %c0_0] : memref<2x128xf32, #tpu.memory_space<vmem>>, vector<2x128xf32>
    %c0_1 = arith.constant 0 : index
    %c0_2 = arith.constant 0 : index
    %1 = vector.load %arg3[%c0_1, %c0_2] : memref<128x128xf32, #tpu.memory_space<vmem>>, vector<128x128xf32>
    %cst = arith.constant dense<0.000000e+00> : vector<2x128xf32>
    %2 = tpu.matmul %0, %1, %cst {dimension_numbers = #tpu.dot_dimension_numbers<[1], [0], [0], [1], [0, 0, 1, 1], [], []>, precision = #tpu.contract_precision<fp32>} : vector<2x128xf32>, vector<128x128xf32>, vector<2x128xf32> -> vector<2x128xf32>
    %c0_3 = arith.constant 0 : index
    %c0_4 = arith.constant 0 : index
    %3 = vector.load %arg2[%c0_3, %c0_4] : memref<1x128xf32, #tpu.memory_space<vmem>>, vector<1x128xf32>
    %4 = vector.broadcast %3 : vector<1x128xf32> to vector<2x128xf32>
    %5 = arith.subf %4, %2 : vector<2x128xf32>
    %c0_5 = arith.constant 0 : index
    %c0_6 = arith.constant 0 : index
    %6 = vector.load %arg4[%c0_5, %c0_6] : memref<2x128xf32, #tpu.memory_space<vmem>>, vector<2x128xf32>
    tpu.vector_store %arg4[%c0_5, %c0_6], %5 {strides = array<i32>} : memref<2x128xf32, #tpu.memory_space<vmem>>, vector<2x128xf32>,
    return
  }
  func.func @transform_0(%arg0: i32) -> (i32, i32) {
    %c0_i32 = arith.constant 0 : i32
    %c0_i32_0 = arith.constant 0 : i32
    return %arg0, %c0_i32 : i32, i32
  }
  func.func @transform_1(%arg0: i32) -> (i32, i32) {
    %c0_i32 = arith.constant 0 : i32
    %c0_i32_0 = arith.constant 0 : i32
    %c0_i32_1 = arith.constant 0 : i32
    return %c0_i32, %c0_i32_0 : i32, i32
  }
  func.func @transform_2(%arg0: i32) -> (i32, i32) {
    %c0_i32 = arith.constant 0 : i32
    %c0_i32_0 = arith.constant 0 : i32
    %c0_i32_1 = arith.constant 0 : i32
    return %c0_i32, %c0_i32_0 : i32, i32
  }
  func.func @transform_3(%arg0: i32) -> (i32, i32) {
    %c0_i32 = arith.constant 0 : i32
    %c0_i32_0 = arith.constant 0 : i32
    return %arg0, %c0_i32 : i32, i32
  }
}

</mosaic_0001>

<bundles_post_ra>
// kernel: tpu_custom_call.1
= control target key start
LH: loop header
LB: loop body
LE: loop exit
PB: predicated region body
PF: predicated region fallthrough
CT: control target
= control target key end

     0   :  { %8 = vsyncpa [#allocation3], 0  ;;  %s1512_s0 = inlined_call_operand.hbm [shape: f32[2,128], index: 0, kind: input, shape index: {}]   ;;  %s1513_s1 = inlined_call_operand.vmem [shape: f32[1,128], index: 1, kind: input, shape index: {}]   ;;  %s1514_s2 = inlined_call_operand.hbm [shape: f32[128,128], index: 2, kind: input, shape index: {}]   ;;  %s1515_s3 = inlined_call_operand.hbm [shape: f32[2,128], index: 3, kind: output, shape index: {}]  }
   0x1   :  { %9 = vsyncpa [#allocation6], 0 }
   0x2   :  { %10 = vsyncpa [#allocation4], 0  ;;  %s1110_s12 = smov [#allocation2]   ;;  %s1111_s14 = smov [#allocation5]  }
   0x3   :  { %s17_s13 = sshll.u32 %s1110_s12, 4  ;;  %s28_s15 = sshll.u32 %s1111_s14, 4  ;;  %s18_s13 = int_to_ptr.vmem [resolvable:$true] %s17_s13  ;;  %s29_s15 = int_to_ptr.vmem [resolvable:$true] %s28_s15 }
   0x4   :  { %s1052_s16 = scalar_lea.vmem %s18_s13, 32  ;;  %p1057_p1 = scmp.lt.s32.totalorder %s18_s13, %s18_s13 }
   0x5   :  { %p1053_p0 = scmp.ne.s32.totalorder %s18_s13, %s1052_s16  ;;  %p1058_p2 = scmp.lt.s32.totalorder %s1052_s16, %s1052_s16 }
   0x7   :  { %p1059_p3 = por %p1058_p2, %p1057_p1 }
   0x9   :  { %p1060_p4 = pnand %p1059_p3, %p1053_p0 }
   0xb   :  { %1063 = shalt.err (!%p1060_p4)
}
   0xc   :  { %20 = dma.hbm_to_vmem [thread:$0]  %s1512_s0, 32, %s18_s13, [#allocation3]  }
   0xd   :  { %s1072_s19 = scalar_lea.vmem %s29_s15, 2048  ;;  %p1077_p6 = scmp.lt.s32.totalorder %s29_s15, %s29_s15 }
   0xe   :  { %p1073_p5 = scmp.ne.s32.totalorder %s29_s15, %s1072_s19  ;;  %p1078_p7 = scmp.lt.s32.totalorder %s1072_s19, %s1072_s19 }
  0x10   :  { %p1079_p8 = por %p1078_p7, %p1077_p6 }
  0x12   :  { %p1080_p9 = pnand %p1079_p8, %p1073_p5 }
  0x14   :  { %1083 = shalt.err (!%p1080_p9)
}
  0x15   :  { %s1112_s20 = smov 128   ;;  %s1113_s21 = smov 8  }
  0x16   :  { %34 = dma.hbm_to_vmem [thread:$0]  %s1514_s2, 2048, %s29_s15, [#allocation6], %s1112_s20, %s1112_s20, %s1113_s21  }
  0x17   :  { %1104 = dma.done.wait [#allocation3], 32  }
  0x18   :  { %1105 = vsyncadd [#allocation3], 4294967264 }
  0x19   :  { %1106 = dma.done.wait [#allocation6], 2048  }
  0x1a   :  { %1107 = vsyncadd [#allocation6], 4294965248  ;;  %v1114_v0 = vmov 0.0   ;;  %vm1115_vm0 = vmmov 0   ;;  %v57_v1 = vld [vmem:[#allocation5 + $0x78] sm:$0xff]  ;;  %v56_v2 = vld [vmem:[#allocation5 + $0x70] sm:$0xff] }
  0x1b   :  { %827 = vmatprep.subr.mxu0 %v1114_v0  ;;  %862 = vmatprep.subr.mxu1 %v1114_v0  ;;  %v55_v3 = vld [vmem:[#allocation5 + $0x68] sm:$0xff]  ;;  %v1149_v4 = vand.u32 4294901760, %v57_v1  ;;  %v1151_v5 = vand.u32 4294901760, %v56_v2  ;;  %v54_v7 = vld [vmem:[#allocation5 + $0x60] sm:$0xff]  ;;  %v53_v8 = vld [vmem:[#allocation5 + $0x58] sm:$0xff]  ;;  %s1116_s24 = smov [#allocation7]  }
  0x1c   :  { %859 = vmatprep.mubr.msk.f32.mxu0 %vm1115_vm0, %v1114_v0  ;;  %894 = vmatprep.mubr.msk.f32.mxu1 %vm1115_vm0, %v1114_v0  ;;  %v1153_v6 = vand.u32 4294901760, %v55_v3  ;;  %v52_v9 = vld [vmem:[#allocation5 + $0x50] sm:$0xff]  ;;  %v1155_v10 = vand.u32 4294901760, %v54_v7  ;;  %v1157_v11 = vand.u32 4294901760, %v53_v8  ;;  %v51_v13 = vld [vmem:[#allocation5 + $0x48] sm:$0xff]  ;;  %v50_v14 = vld [vmem:[#allocation5 + $0x40] sm:$0xff] }
  0x1d   :  { %v1159_v12 = vand.u32 4294901760, %v52_v9  ;;  %828 = vmatpush3.msra.mxu0 %v1149_v4  ;;  %v1163_v15 = vsub.f32 %v57_v1, %v1149_v4  ;;  %v1166_v16 = vsub.f32 %v56_v2, %v1151_v5  ;;  %v1168_v17 = vand.u32 4294901760, %v51_v13  ;;  %v49_v19 = vld [vmem:[#allocation5 + $0x38] sm:$0xff]  ;;  %v48_v26 = vld [vmem:[#allocation5 + $0x30] sm:$0xff]  ;;  %v47_v36 = vld [vmem:[#allocation5 + $0x28] sm:$0xff]  ;;  %s714_s25 = sshll.u32 %s1116_s24, 4  ;;  %s715_s25 = int_to_ptr.vmem [resolvable:$true] %s714_s25 }
  0x1e   :  { %v1171_v18 = vsub.f32 %v55_v3, %v1153_v6  ;;  %829 = vmatprep.subr.mxu0 %v1114_v0  ;;  %v1175_v20 = vsub.f32 %v54_v7, %v1155_v10  ;;  %v1178_v21 = vsub.f32 %v53_v8, %v1157_v11  ;;  %v1184_v25 = vand.u32 4294901760, %v50_v14  ;;  %v46_v41 = vld [vmem:[#allocation5 + $0x20] sm:$0xff]  ;;  %v45_v49 = vld [vmem:[#allocation5 + $0x18] sm:$0xff]  ;;  %v44_v54 = vld [vmem:[#allocation5 + $0x10] sm:$0xff]  ;;  %s1084_s26 = scalar_lea.vmem %s715_s25, 32  ;;  %p1089_p11 = scmp.lt.s32.totalorder %s715_s25, %s715_s25 }
  0x1f   :  { %830 = vmatpush3.msra.mxu0 %v1151_v5  ;;  %v152_v22 = vand.u32 4294901760, %v1163_v15  ;;  %v159_v23 = vand.u32 4294901760, %v1166_v16  ;;  %v1188_v28 = vand.u32 4294901760, %v49_v19  ;;  %v1192_v30 = vsub.f32 %v52_v9, %v1159_v12  ;;  %v41_v50 = vld [vmem:[#allocation2] sm:$0x3]  ;;  %v43_v60 = vld [vmem:[#allocation5 + $0x8] sm:$0xff]  ;;  %p1085_p10 = scmp.ne.s32.totalorder %s715_s25, %s1084_s26  ;;  %p1090_p12 = scmp.lt.s32.totalorder %s1084_s26, %s1084_s26 }
  0x20   :  { %v166_v24 = vand.u32 4294901760, %v1171_v18  ;;  %831 = vmatprep.subr.mxu0 %v1114_v0  ;;  %v173_v27 = vand.u32 4294901760, %v1175_v20  ;;  %v180_v29 = vand.u32 4294901760, %v1178_v21  ;;  %v1205_v34 = vsub.f32 %v51_v13, %v1168_v17  ;;  %v42_v7 = vld [vmem:[#allocation5] sm:$0xff] }
  0x21   :  { %832 = vmatpush3.msra.mxu0 %v1153_v6  ;;  %v153_v31 = vsub.f32 %v1163_v15, %v152_v22  ;;  %v160_v32 = vsub.f32 %v1166_v16, %v159_v23  ;;  %v1208_v35 = vand.u32 4294901760, %v48_v26  ;;  %v187_v40 = vand.u32 4294901760, %v1192_v30  ;;  %p1091_p13 = por %p1090_p12, %p1089_p11 }
  0x22   :  { %v167_v33 = vsub.f32 %v1171_v18, %v166_v24  ;;  %833 = vmatprep.subr.mxu0 %v1114_v0  ;;  %v174_v39 = vsub.f32 %v1175_v20, %v173_v27  ;;  %v181_v42 = vsub.f32 %v1178_v21, %v180_v29  ;;  %v1220_v43 = vsub.f32 %v50_v14, %v1184_v25 }
  0x23   :  { %834 = vmatpush3.msra.mxu0 %v1155_v10  ;;  %v154_v37 = vand.u32 4294901760, %v153_v31  ;;  %v161_v38 = vand.u32 4294901760, %v160_v32  ;;  %v1223_v45 = vand.u32 4294901760, %v47_v36  ;;  %v194_v46 = vand.u32 4294901760, %v1205_v34  ;;  %p1092_p0 = pnand %p1091_p13, %p1085_p10 }
  0x24   :  { %835 = vmatprep.subr.mxu0 %v1114_v0  ;;  %v168_v44 = vand.u32 4294901760, %v167_v33  ;;  %v1227_v47 = vsub.f32 %v49_v19, %v1188_v28  ;;  %v1231_v48 = vand.u32 4294901760, %v46_v41  ;;  %v175_v51 = vand.u32 4294901760, %v174_v39 }
  0x25   :  { %836 = vmatpush3.msra.mxu0 %v1157_v11  ;;  %863 = vmatpush3.msra.mxu1 %v154_v37  ;;  %v188_v52 = vsub.f32 %v1192_v30, %v187_v40  ;;  %v201_v53 = vand.u32 4294901760, %v1220_v43  ;;  %v1239_v55 = vsub.f32 %v48_v26, %v1208_v35  ;;  %v182_v56 = vand.u32 4294901760, %v181_v42 }
  0x26   :  { %837 = vmatprep.subr.mxu0 %v1114_v0  ;;  %864 = vmatprep.subr.mxu1 %v1114_v0  ;;  %v208_v57 = vand.u32 4294901760, %v1227_v47  ;;  %v195_v58 = vsub.f32 %v1205_v34, %v194_v46  ;;  %v1248_v59 = vand.u32 4294901760, %v45_v49  ;;  %v1251_v61 = vsub.f32 %v47_v36, %v1223_v45 }
  0x27   :  { %838 = vmatpush3.msra.mxu0 %v1159_v12  ;;  %865 = vmatpush3.msra.mxu1 %v161_v38  ;;  %v1253_v62 = vand.u32 4294901760, %v41_v50  ;;  %v1257_v63 = vand.u32 4294901760, %v44_v54  ;;  %v189_v1 = vand.u32 4294901760, %v188_v52  ;;  %v202_v2 = vsub.f32 %v1220_v43, %v201_v53 }
  0x28   :  { %839 = vmatprep.subr.mxu0 %v1114_v0  ;;  %866 = vmatprep.subr.mxu1 %v1114_v0  ;;  %v215_v3 = vand.u32 4294901760, %v1239_v55  ;;  %v1265_v8 = vsub.f32 %v46_v41, %v1231_v48  ;;  %v209_v9 = vsub.f32 %v1227_v47, %v208_v57  ;;  %v1272_v13 = vand.u32 4294901760, %v43_v60 }
  0x29   :  { %840 = vmatpush3.msra.mxu0 %v1168_v17  ;;  %867 = vmatpush3.msra.mxu1 %v168_v44  ;;  %v196_v14 = vand.u32 4294901760, %v195_v58  ;;  %v222_v19 = vand.u32 4294901760, %v1251_v61  ;;  %v1277_v26 = vsub.f32 %v41_v50, %v1253_v62  ;;  %v1280_v31 = vsub.f32 %v45_v49, %v1248_v59 }
  0x2a   :  { %841 = vmatprep.subr.mxu0 %v1114_v0  ;;  %868 = vmatprep.subr.mxu1 %v1114_v0  ;;  %v1284_v32 = vand.u32 4294901760, %v42_v7  ;;  %v203_v33 = vand.u32 4294901760, %v202_v2  ;;  %v216_v36 = vsub.f32 %v1239_v55, %v215_v3  ;;  %v229_v37 = vand.u32 4294901760, %v1265_v8 }
  0x2b   :  { %842 = vmatpush3.msra.mxu0 %v1184_v25  ;;  %869 = vmatpush3.msra.mxu1 %v175_v51  ;;  %v1292_v38 = vsub.f32 %v44_v54, %v1257_v63  ;;  %v210_v39 = vand.u32 4294901760, %v209_v9  ;;  %v223_v41 = vsub.f32 %v1251_v61, %v222_v19  ;;  %v141_v42 = vand.u32 4294901760, %v1277_v26 }
  0x2c   :  { %843 = vmatprep.subr.mxu0 %v1114_v0  ;;  %870 = vmatprep.subr.mxu1 %v1114_v0  ;;  %v236_v44 = vand.u32 4294901760, %v1280_v31  ;;  %v1303_v49 = vsub.f32 %v43_v60, %v1272_v13  ;;  %v217_v50 = vand.u32 4294901760, %v216_v36  ;;  %v230_v51 = vsub.f32 %v1265_v8, %v229_v37 }
  0x2d   :  { %844 = vmatpush3.msra.mxu0 %v1188_v28  ;;  %871 = vmatpush3.msra.mxu1 %v182_v56  ;;  %v243_v52 = vand.u32 4294901760, %v1292_v38  ;;  %v1313_v54 = vsub.f32 %v42_v7, %v1284_v32  ;;  %v224_v56 = vand.u32 4294901760, %v223_v41  ;;  %v142_v58 = vsub.f32 %v1277_v26, %v141_v42 }
  0x2e   :  { %845 = vmatprep.subr.mxu0 %v1114_v0  ;;  %872 = vmatprep.subr.mxu1 %v1114_v0  ;;  %v237_v60 = vsub.f32 %v1280_v31, %v236_v44  ;;  %v231_v2 = vand.u32 4294901760, %v230_v51 }
  0x2f   :  { %846 = vmatpush3.msra.mxu0 %v1208_v35  ;;  %873 = vmatpush3.msra.mxu1 %v189_v1  ;;  %v250_v1 = vand.u32 4294901760, %v1303_v49  ;;  %v244_v7 = vsub.f32 %v1292_v38, %v243_v52  ;;  %v257_v9 = vand.u32 4294901760, %v1313_v54 }
  0x30   :  { %847 = vmatprep.subr.mxu0 %v1114_v0  ;;  %874 = vmatprep.subr.mxu1 %v1114_v0 }
  0x31   :  { %848 = vmatpush3.msra.mxu0 %v1223_v45  ;;  %875 = vmatpush3.msra.mxu1 %v196_v14  ;;  %v143_v14 = vand.u32 4294901760, %v142_v58  ;;  %v251_v36 = vsub.f32 %v1303_v49, %v250_v1  ;;  %v258_v41 = vsub.f32 %v1313_v54, %v257_v9 }
  0x32   :  { %849 = vmatprep.subr.mxu0 %v1114_v0  ;;  %876 = vmatprep.subr.mxu1 %v1114_v0 }
  0x33   :  { %850 = vmatpush3.msra.mxu0 %v1231_v48  ;;  %877 = vmatpush3.msra.mxu1 %v203_v33  ;;  %v238_v33 = vand.u32 4294901760, %v237_v60  ;;  %v259_v51 = vand.u32 4294901760, %v258_v41 }
  0x34   :  { %851 = vmatprep.subr.mxu0 %v1114_v0  ;;  %878 = vmatprep.subr.mxu1 %v1114_v0 }
  0x35   :  { %852 = vmatpush3.msra.mxu0 %v1248_v59  ;;  %879 = vmatpush3.msra.mxu1 %v210_v39  ;;  %v245_v39 = vand.u32 4294901760, %v244_v7 }
  0x36   :  { %853 = vmatprep.subr.mxu0 %v1114_v0  ;;  %880 = vmatprep.subr.mxu1 %v1114_v0 }
  0x37   :  { %854 = vmatpush3.msra.mxu0 %v1257_v63  ;;  %881 = vmatpush3.msra.mxu1 %v217_v50  ;;  %v252_v50 = vand.u32 4294901760, %v251_v36 }
  0x38   :  { %855 = vmatprep.subr.mxu0 %v1114_v0  ;;  %882 = vmatprep.subr.mxu1 %v1114_v0 }
  0x39   :  { %856 = vmatpush3.msra.mxu0 %v1272_v13  ;;  %883 = vmatpush3.msra.mxu1 %v224_v56 }
  0x3a   :  { %857 = vmatprep.subr.mxu0 %v1114_v0  ;;  %884 = vmatprep.subr.mxu1 %v1114_v0 }
  0x3b   :  { %858 = vmatpush3.msra.mxu0 %v1284_v32  ;;  %885 = vmatpush3.msra.mxu1 %v231_v2 }
  0x3c   :  { %886 = vmatprep.subr.mxu1 %v1114_v0  ;;  %897 = vmatprep.subr.mxu0 %v1114_v0 }
  0x3d   :  { %860 = vmatmul.mubr.f32.vlgmr.msra.gmra.mxu0 %v143_v14  ;;  %887 = vmatpush3.msra.mxu1 %v238_v33 }
  0x3e   :  { %898 = vmatpush3.msra.mxu0 %v1163_v15  ;;  %888 = vmatprep.subr.mxu1 %v1114_v0 }
  0x3f   :  { %899 = vmatprep.subr.mxu0 %v1114_v0  ;;  %889 = vmatpush3.msra.mxu1 %v245_v39 }
  0x40   :  { %900 = vmatpush3.msra.mxu0 %v1166_v16  ;;  %890 = vmatprep.subr.mxu1 %v1114_v0 }
  0x41   :  { %901 = vmatprep.subr.mxu0 %v1114_v0  ;;  %891 = vmatpush3.msra.mxu1 %v252_v50 }
  0x42   :  { %902 = vmatpush3.msra.mxu0 %v1171_v18  ;;  %892 = vmatprep.subr.mxu1 %v1114_v0 }
  0x43   :  { %903 = vmatprep.subr.mxu0 %v1114_v0  ;;  %893 = vmatpush3.msra.mxu1 %v259_v51 }
  0x44   :  { %904 = vmatpush3.msra.mxu0 %v1175_v20  ;;  %895 = vmatmul.mubr.f32.vlgmr.msra.gmra.mxu1 %v1253_v62 }
  0x45   :  { %905 = vmatprep.subr.mxu0 %v1114_v0  ;;  %932 = vmatprep.subr.mxu1 %v1114_v0 }
  0x46   :  { %906 = vmatpush3.msra.mxu0 %v1178_v21  ;;  %933 = vmatpush3.msra.mxu1 %v1149_v4 }
  0x47   :  { %907 = vmatprep.subr.mxu0 %v1114_v0  ;;  %934 = vmatprep.subr.mxu1 %v1114_v0 }
  0x48   :  { %908 = vmatpush3.msra.mxu0 %v1192_v30  ;;  %935 = vmatpush3.msra.mxu1 %v1151_v5 }
  0x49   :  { %909 = vmatprep.subr.mxu0 %v1114_v0  ;;  %936 = vmatprep.subr.mxu1 %v1114_v0 }
  0x4a   :  { %910 = vmatpush3.msra.mxu0 %v1205_v34  ;;  %937 = vmatpush3.msra.mxu1 %v1153_v6 }
  0x4b   :  { %911 = vmatprep.subr.mxu0 %v1114_v0  ;;  %938 = vmatprep.subr.mxu1 %v1114_v0 }
  0x4c   :  { %912 = vmatpush3.msra.mxu0 %v1220_v43  ;;  %939 = vmatpush3.msra.mxu1 %v1155_v10 }
  0x4d   :  { %913 = vmatprep.subr.mxu0 %v1114_v0  ;;  %940 = vmatprep.subr.mxu1 %v1114_v0 }
  0x4e   :  { %914 = vmatpush3.msra.mxu0 %v1227_v47  ;;  %941 = vmatpush3.msra.mxu1 %v1157_v11 }
  0x4f   :  { %915 = vmatprep.subr.mxu0 %v1114_v0  ;;  %942 = vmatprep.subr.mxu1 %v1114_v0 }
  0x50   :  { %916 = vmatpush3.msra.mxu0 %v1239_v55  ;;  %943 = vmatpush3.msra.mxu1 %v1159_v12 }
  0x51   :  { %917 = vmatprep.subr.mxu0 %v1114_v0  ;;  %944 = vmatprep.subr.mxu1 %v1114_v0 }
  0x52   :  { %918 = vmatpush3.msra.mxu0 %v1251_v61  ;;  %945 = vmatpush3.msra.mxu1 %v1168_v17 }
  0x53   :  { %919 = vmatprep.subr.mxu0 %v1114_v0  ;;  %946 = vmatprep.subr.mxu1 %v1114_v0 }
  0x54   :  { %920 = vmatpush3.msra.mxu0 %v1265_v8  ;;  %947 = vmatpush3.msra.mxu1 %v1184_v25 }
  0x55   :  { %921 = vmatprep.subr.mxu0 %v1114_v0  ;;  %948 = vmatprep.subr.mxu1 %v1114_v0 }
  0x56   :  { %922 = vmatpush3.msra.mxu0 %v1280_v31  ;;  %949 = vmatpush3.msra.mxu1 %v1188_v28 }
  0x57   :  { %923 = vmatprep.subr.mxu0 %v1114_v0  ;;  %950 = vmatprep.subr.mxu1 %v1114_v0 }
  0x58   :  { %924 = vmatpush3.msra.mxu0 %v1292_v38  ;;  %951 = vmatpush3.msra.mxu1 %v1208_v35 }
  0x59   :  { %925 = vmatprep.subr.mxu0 %v1114_v0  ;;  %952 = vmatprep.subr.mxu1 %v1114_v0 }
  0x5a   :  { %926 = vmatpush3.msra.mxu0 %v1303_v49  ;;  %953 = vmatpush3.msra.mxu1 %v1223_v45 }
  0x5b   :  { %927 = vmatprep.subr.mxu0 %v1114_v0  ;;  %954 = vmatprep.subr.mxu1 %v1114_v0 }
  0x5c   :  { %928 = vmatpush3.msra.mxu0 %v1313_v54  ;;  %929 = vmatprep.mubr.msk.f32.mxu0 %vm1115_vm0, %v1114_v0 }
  0x5d   :  { %955 = vmatpush3.msra.mxu1 %v1231_v48  ;;  %930 = vmatmul.mubr.f32.vlgmr.msra.gmra.mxu0 %v1277_v26 }
  0x5e   :  { %956 = vmatprep.subr.mxu1 %v1114_v0  ;;  %967 = vmatprep.subr.mxu0 %v1114_v0 }
  0x5f   :  { %957 = vmatpush3.msra.mxu1 %v1248_v59  ;;  %968 = vmatpush3.msra.mxu0 %v152_v22 }
  0x60   :  { %958 = vmatprep.subr.mxu1 %v1114_v0  ;;  %969 = vmatprep.subr.mxu0 %v1114_v0 }
  0x61   :  { %959 = vmatpush3.msra.mxu1 %v1257_v63  ;;  %970 = vmatpush3.msra.mxu0 %v159_v23 }
  0x62   :  { %960 = vmatprep.subr.mxu1 %v1114_v0  ;;  %971 = vmatprep.subr.mxu0 %v1114_v0 }
  0x63   :  { %961 = vmatpush3.msra.mxu1 %v1272_v13  ;;  %972 = vmatpush3.msra.mxu0 %v166_v24 }
  0x64   :  { %962 = vmatprep.subr.mxu1 %v1114_v0  ;;  %973 = vmatprep.subr.mxu0 %v1114_v0 }
  0x65   :  { %963 = vmatpush3.msra.mxu1 %v1284_v32  ;;  %964 = vmatprep.mubr.msk.f32.mxu1 %vm1115_vm0, %v1114_v0 }
  0x66   :  { %974 = vmatpush3.msra.mxu0 %v173_v27  ;;  %965 = vmatmul.mubr.f32.vlgmr.msra.gmra.mxu1 %v141_v42 }
  0x67   :  { %975 = vmatprep.subr.mxu0 %v1114_v0  ;;  %1002 = vmatprep.subr.mxu1 %v1114_v0 }
  0x68   :  { %976 = vmatpush3.msra.mxu0 %v180_v29  ;;  %1003 = vmatpush3.msra.mxu1 %v1149_v4 }
  0x69   :  { %977 = vmatprep.subr.mxu0 %v1114_v0  ;;  %1004 = vmatprep.subr.mxu1 %v1114_v0 }
  0x6a   :  { %978 = vmatpush3.msra.mxu0 %v187_v40  ;;  %1005 = vmatpush3.msra.mxu1 %v1151_v5 }
  0x6b   :  { %979 = vmatprep.subr.mxu0 %v1114_v0  ;;  %1006 = vmatprep.subr.mxu1 %v1114_v0 }
  0x6c   :  { %980 = vmatpush3.msra.mxu0 %v194_v46  ;;  %1007 = vmatpush3.msra.mxu1 %v1153_v6 }
  0x6d   :  { %981 = vmatprep.subr.mxu0 %v1114_v0  ;;  %1008 = vmatprep.subr.mxu1 %v1114_v0 }
  0x6e   :  { %982 = vmatpush3.msra.mxu0 %v201_v53  ;;  %1009 = vmatpush3.msra.mxu1 %v1155_v10 }
  0x6f   :  { %983 = vmatprep.subr.mxu0 %v1114_v0  ;;  %1010 = vmatprep.subr.mxu1 %v1114_v0 }
  0x70   :  { %984 = vmatpush3.msra.mxu0 %v208_v57  ;;  %1011 = vmatpush3.msra.mxu1 %v1157_v11 }
  0x71   :  { %985 = vmatprep.subr.mxu0 %v1114_v0  ;;  %1012 = vmatprep.subr.mxu1 %v1114_v0 }
  0x72   :  { %986 = vmatpush3.msra.mxu0 %v215_v3  ;;  %1013 = vmatpush3.msra.mxu1 %v1159_v12 }
  0x73   :  { %987 = vmatprep.subr.mxu0 %v1114_v0  ;;  %1014 = vmatprep.subr.mxu1 %v1114_v0 }
  0x74   :  { %988 = vmatpush3.msra.mxu0 %v222_v19  ;;  %1015 = vmatpush3.msra.mxu1 %v1168_v17 }
  0x75   :  { %989 = vmatprep.subr.mxu0 %v1114_v0  ;;  %1016 = vmatprep.subr.mxu1 %v1114_v0 }
  0x76   :  { %990 = vmatpush3.msra.mxu0 %v229_v37  ;;  %1017 = vmatpush3.msra.mxu1 %v1184_v25 }
  0x77   :  { %991 = vmatprep.subr.mxu0 %v1114_v0  ;;  %1018 = vmatprep.subr.mxu1 %v1114_v0 }
  0x78   :  { %992 = vmatpush3.msra.mxu0 %v236_v44  ;;  %1019 = vmatpush3.msra.mxu1 %v1188_v28 }
  0x79   :  { %993 = vmatprep.subr.mxu0 %v1114_v0  ;;  %1020 = vmatprep.subr.mxu1 %v1114_v0 }
  0x7a   :  { %994 = vmatpush3.msra.mxu0 %v243_v52  ;;  %1021 = vmatpush3.msra.mxu1 %v1208_v35 }
  0x7b   :  { %995 = vmatprep.subr.mxu0 %v1114_v0  ;;  %1022 = vmatprep.subr.mxu1 %v1114_v0 }
  0x7c   :  { %996 = vmatpush3.msra.mxu0 %v250_v1  ;;  %1023 = vmatpush3.msra.mxu1 %v1223_v45 }
  0x7d   :  { %997 = vmatprep.subr.mxu0 %v1114_v0  ;;  %1024 = vmatprep.subr.mxu1 %v1114_v0 }
  0x7e   :  { %998 = vmatpush3.msra.mxu0 %v257_v9  ;;  %999 = vmatprep.mubr.msk.f32.mxu0 %vm1115_vm0, %v1114_v0 }
  0x7f   :  { %1025 = vmatpush3.msra.mxu1 %v1231_v48  ;;  %1000 = vmatmul.mubr.f32.vlgmr.msra.gmra.mxu0 %v1253_v62 }
  0x80   :  { %1026 = vmatprep.subr.mxu1 %v1114_v0  ;;  %1034 = vmatprep.mubr.msk.f32.mxu1 %vm1115_vm0, %v1114_v0 }
  0x81   :  { %1027 = vmatpush3.msra.mxu1 %v1248_v59 }
  0x82   :  { %1028 = vmatprep.subr.mxu1 %v1114_v0 }
  0x83   :  { %1029 = vmatpush3.msra.mxu1 %v1257_v63 }
  0x84   :  { %1030 = vmatprep.subr.mxu1 %v1114_v0 }
  0x85   :  { %1031 = vmatpush3.msra.mxu1 %v1272_v13 }
  0x86   :  { %1032 = vmatprep.subr.mxu1 %v1114_v0  ;;  %v724_v0 = vld [vmem:[%s1513_s1] ss:$0 sm:$0xff] }
  0x87   :  { %1033 = vmatpush3.msra.mxu1 %v1284_v32 }
  0x88   :  { %1035 = vmatmul.mubr.f32.vlgmr.msra.gmra.mxu1 %v1253_v62 }
  0xfd   :  { %v145_v4 = vpop.f32.mrf.mxu0 }
  0xff   :  { %v861_v5 = vpop.f32.mrf.mxu0 }
 0x104   :  { %v296_v6 = vpop.f32.mrf.mxu1 }
 0x105   :  { %v297_v18 = vadd.f32 %v296_v6, %v145_v4 }
 0x106   :  { %v896_v10 = vpop.f32.mrf.mxu1 }
 0x11d   :  { %v400_v11 = vpop.f32.mrf.mxu0 }
 0x11e   :  { %v401_v21 = vadd.f32 %v400_v11, %v297_v18 }
 0x11f   :  { %v931_v12 = vpop.f32.mrf.mxu0 }
 0x126   :  { %v489_v15 = vpop.f32.mrf.mxu1 }
 0x127   :  { %v490_v22 = vadd.f32 %v489_v15, %v401_v21 }
 0x128   :  { %v966_v16 = vpop.f32.mrf.mxu1 }
 0x13f   :  { %v608_v17 = vpop.f32.mrf.mxu0 }
 0x140   :  { %v609_v23 = vadd.f32 %v608_v17, %v490_v22 }
 0x141   :  { %v1001_v20 = vpop.f32.mrf.mxu0 }
 0x148   :  { %v695_v24 = vpop.f32.mrf.mxu1 }
 0x149   :  { %v696_v25 = vadd.f32 %v695_v24, %v609_v23 }
 0x14a   :  { %v1036_v27 = vpop.f32.mrf.mxu1 }
 0x14b   :  { %v706_v28 = vsub.f32 %v724_v0, %v696_v25 }
 0x14d   :  { %707 = vst [vmem:[#allocation7] sm:$0x3] %v706_v28 }
 0x14e   :  { %1095 = shalt.err (!%p1092_p0)
}
 0x14f   :  { %717 = dma.vmem_to_hbm [thread:$0]  %s715_s25, 32, %s1515_s3, [#allocation4]  }
 0x150   :  { %1108 = dma.done.wait [#allocation4], 32  }
 0x151   :  { %1109 = vsyncadd [#allocation4], 4294967264 }
 0x152   :  { %721 = vsyncpa [#allocation3], 1 }
 0x153   :  { %722 = vsyncpa [#allocation6], 1 }
 0x154   :  { %723 = vsyncpa [#allocation4], 1 }

</bundles_post_ra>
